<compile_context>
chip_gen: v7x
topology: tpu7x:2x2x1
jax: 0.10.0
libtpu: 0.0.40
codegen_flags: <defaults>
</compile_context>

<pallas_src>
import jax
import jax.numpy as jnp
from jax.experimental import pallas as pl
from jax.experimental.pallas import tpu as pltpu

_DEFAULT_BLOCK_BYTES = 4 * 1024 * 1024  # ~4 MiB per input block


def _channel_dropout_kernel(x_ref, keep_ref, o_ref):
    # x_ref: (r_blk, n_blk); keep_ref: (r_blk, 1) already in x.dtype.
    o_ref[...] = x_ref[...] * keep_ref[...]


def _round_down(x, m):
    return (x // m) * m


def _choose_lane_width(hw, c):
    """Lane width for the densified (C*R, L) layout used when C < 8.

    Prefers widths that leave >= 64 total rows (dense sublane tiling), then
    falls back to the widest 128-multiple dividing H*W.  Returns None when no
    128-multiple divides H*W (caller uses the plain (C, H*W) layout).
    """
    candidates = (4096, 2048, 1024, 512, 256, 128)
    for lane in candidates:
        if hw % lane == 0 and (hw // lane) * c >= 64:
            return lane
    for lane in candidates:
        if hw % lane == 0:
            return lane
    return None


def random_channel_dropout(x, key, drop_prob=0.1, *,
                           block_bytes=_DEFAULT_BLOCK_BYTES):
    """Apply RandomChannelDropout to x of shape [C, H, W].

    TODO(synk): PyTorch draws from Python's global `random` per call and
    mutates x in place; here the randomness is functional via an explicit JAX
    key (output optionally reuses x's buffer via donation).
    """
    C, H, W = x.shape
    HW = H * W
    itemsize = jnp.dtype(x.dtype).itemsize

    # Per-channel keep decisions, pre-cast to x.dtype so the kernel is a
    # single broadcast multiply (no per-step int->float convert).
    drop = jax.random.uniform(key, (C,)) < drop_prob
    keep = jnp.where(drop, 0, 1).astype(x.dtype)

    # ---- lane-dense 2-D view ------------------------------------------------
    lane = _choose_lane_width(HW, C) if C < 8 else None
    if lane is not None:
        # Densified layout: fold spatial rows into the sublane dim so vregs
        # (and the single vst slot) are fully utilised even for RGB inputs.
        rows_per_c = HW // lane
        rows, lane_ext = C * rows_per_c, lane
        x2d = x.reshape(rows, lane_ext)
        mask = jnp.repeat(keep, rows_per_c).reshape(rows, 1)
    else:
        rows, lane_ext = C, HW
        x2d = x.reshape(rows, lane_ext)
        mask = keep.reshape(rows, 1)

    # ---- block sizing (fixed, aligned; cdiv grid handles ragged edges) ------
    # Lane block: full extent if it fits the byte target with >= 8 sublanes,
    # else the largest 128-multiple that does.
    max_lane = max(128, _round_down(block_bytes // (8 * itemsize), 128))
    n_blk = lane_ext if lane_ext <= max_lane else max_lane
    # Row block: full extent if it fits the target, else a multiple of 8.
    max_rows = max(8, _round_down(block_bytes // (n_blk * itemsize), 8))
    r_blk = rows if rows <= max_rows else max_rows

    grid = (pl.cdiv(rows, r_blk), pl.cdiv(lane_ext, n_blk))

    # Explicit scoped-VMEM budget: 2 in + 2 out double-buffered blocks, two
    # mask buffers (padded to an (8,128) tile), plus compiler headroom.
    blk_bytes = r_blk * n_blk * itemsize
    mask_blk_bytes = (-(-r_blk // 8)) * 8 * 128 * itemsize
    vmem_limit = int(min(48 << 20,
                         max(16 << 20,
                             4 * blk_bytes + 2 * mask_blk_bytes + (8 << 20))))

    out2d = pl.pallas_call(
        _channel_dropout_kernel,
        out_shape=jax.ShapeDtypeStruct((rows, lane_ext), x.dtype),
        grid_spec=pl.GridSpec(
            grid=grid,
            in_specs=[
                pl.BlockSpec((r_blk, n_blk), lambda ri, ni: (ri, ni)),
                # Mask block index is independent of the lane axis: resident
                # when there is one row block, re-fetched only on row-block
                # change otherwise (no per-step tiny DMA in steady state).
                pl.BlockSpec((r_blk, 1), lambda ri, ni: (ri, 0)),
            ],
            out_specs=pl.BlockSpec((r_blk, n_blk), lambda ri, ni: (ri, ni)),
        ),
        compiler_params=pltpu.CompilerParams(
            dimension_semantics=("parallel", "parallel"),
            vmem_limit_bytes=vmem_limit,
        ),
        cost_estimate=pl.CostEstimate(
            flops=C * HW,
            transcendentals=0,
            bytes_accessed=2 * C * HW * itemsize + C * itemsize,
        ),
        # Donate x's buffer to the output: no second full-size HBM allocation
        # when the caller no longer needs x.
        input_output_aliases={0: 0},
    )(x2d, mask)

    # TODO(synk): optional scalar-prefetch variant that only zero-writes the
    # dropped channels (relying on the alias for kept channels) would cut HBM
    # traffic to ~drop_prob of this streaming path; omitted for robustness.
    return out2d.reshape(C, H, W)


def _reference(x, key, drop_prob):
    C = x.shape[0]
    drop = jax.random.uniform(key, (C,)) < drop_prob
    keep = jnp.where(drop, 0.0, 1.0).astype(x.dtype)
    return x * keep[:, None, None]


if __name__ == "__main__":
    key = jax.random.PRNGKey(0)
    ks = jax.random.split(key, 8)
    p = 0.5  # high so both kept and dropped channels are exercised

    # 1) Small [C, H, W] matching the module's expectation (C=4 image-like).
    x1 = jax.random.normal(ks[0], (4, 16, 16), dtype=jnp.float32)
    y1 = jax.block_until_ready(random_channel_dropout(x1, ks[1], p))
    assert jnp.allclose(y1, _reference(x1, ks[1], p)), "mismatch (small case)"

    # 2) C=32: plain (C, HW) layout, resident mask, single 2 MiB block.
    x2 = jax.random.normal(ks[2], (32, 128, 128), dtype=jnp.float32)
    y2 = jax.block_until_ready(random_channel_dropout(x2, ks[3], p))
    assert jnp.allclose(y2, _reference(x2, ks[3], p)), "mismatch (C=32 case)"

    # 3) Small-C densified layout: C=3 folded to (72, 512) dense rows.
    x3 = jax.random.normal(ks[4], (3, 128, 96), dtype=jnp.float32)
    y3 = jax.block_until_ready(random_channel_dropout(x3, ks[5], p))
    assert jnp.allclose(y3, _reference(x3, ks[5], p)), "mismatch (densified case)"

    # 4) Ragged cdiv tiling on both grid axes + multi-row-block mask, forced
    #    by a small block-byte budget (grid (5, 2) over a (37, 2400) view).
    x4 = jax.random.normal(ks[6], (37, 24, 100), dtype=jnp.float32)
    y4 = jax.block_until_ready(
        random_channel_dropout(x4, ks[7], p, block_bytes=64 * 1024))
    assert jnp.allclose(y4, _reference(x4, ks[7], p)), "mismatch (ragged case)"

    print("KERNEL_OK")
</pallas_src>

<mosaic_0001>
module attributes {stable_mosaic.version = 11 : i64} {
  func.func @_channel_dropout_kernel(%arg0: i32, %arg1: i32, %arg2: memref<4x256xf32, #tpu.memory_space<vmem>>, %arg3: memref<4x1xf32, #tpu.memory_space<vmem>>, %arg4: memref<4x256xf32, #tpu.memory_space<vmem>>) attributes {dimension_semantics = [#tpu.dimension_semantics<parallel>, #tpu.dimension_semantics<parallel>], iteration_bounds = array<i64: 1, 1>, scalar_prefetch = 0 : i64, scratch_operands = 0 : i64, tpu.core_type = #tpu.core_type<tc>, window_params = [{transform_indices = @transform_0, window_bounds = array<i64: 4, 256>}, {transform_indices = @transform_1, window_bounds = array<i64: 4, 1>}, {transform_indices = @transform_2, window_bounds = array<i64: 4, 256>}]} {
    %c0 = arith.constant 0 : index
    %c0_0 = arith.constant 0 : index
    %0 = vector.load %arg2[%c0, %c0_0] : memref<4x256xf32, #tpu.memory_space<vmem>>, vector<4x256xf32>
    %c0_1 = arith.constant 0 : index
    %c0_2 = arith.constant 0 : index
    %1 = vector.load %arg3[%c0_1, %c0_2] : memref<4x1xf32, #tpu.memory_space<vmem>>, vector<4x1xf32>
    %2 = vector.broadcast %1 : vector<4x1xf32> to vector<4x256xf32>
    %3 = arith.mulf %0, %2 : vector<4x256xf32>
    %c0_3 = arith.constant 0 : index
    %c0_4 = arith.constant 0 : index
    %4 = vector.load %arg4[%c0_3, %c0_4] : memref<4x256xf32, #tpu.memory_space<vmem>>, vector<4x256xf32>
    tpu.vector_store %arg4[%c0_3, %c0_4], %3 {strides = array<i32>} : memref<4x256xf32, #tpu.memory_space<vmem>>, vector<4x256xf32>,
    return
  }
  func.func @transform_0(%arg0: i32, %arg1: i32) -> (i32, i32) {
    %c0_i32 = arith.constant 0 : i32
    return %arg0, %arg1 : i32, i32
  }
  func.func @transform_1(%arg0: i32, %arg1: i32) -> (i32, i32) {
    %c0_i32 = arith.constant 0 : i32
    %c0_i32_0 = arith.constant 0 : i32
    return %arg0, %c0_i32 : i32, i32
  }
  func.func @transform_2(%arg0: i32, %arg1: i32) -> (i32, i32) {
    %c0_i32 = arith.constant 0 : i32
    return %arg0, %arg1 : i32, i32
  }
}

</mosaic_0001>

<bundles_post_ra>
// kernel: tpu_custom_call.1
= control target key start
LH: loop header
LB: loop body
LE: loop exit
PB: predicated region body
PF: predicated region fallthrough
CT: control target
= control target key end

     0   :  { %7 = vsyncpa [#allocation3], 0  ;;  %s154_s0 = inlined_call_operand.hbm [shape: f32[4,256], index: 0, kind: input, shape index: {}, may-alias: {0,2}]   ;;  %s155_s1 = inlined_call_operand.vmem [shape: f32[4,1], index: 1, kind: input, shape index: {}]   ;;  %s156_s2 = inlined_call_operand.hbm [shape: f32[4,256], index: 2, kind: output, shape index: {}, may-alias: {0,2}]  }
   0x1   :  { %8 = vsyncpa [#allocation4], 0  ;;  %s108_s9 = smov [#allocation2]   ;;  %s60_s13 = scalar_lea.hbm %s154_s0, 128 }
   0x2   :  { %s15_s10 = sshll.u32 %s108_s9, 4  ;;  %p61_p0 = scmp.ne.s32.totalorder %s154_s0, %s60_s13  ;;  %s16_s10 = int_to_ptr.vmem [resolvable:$true] %s15_s10 }
   0x3   :  { %p64_p1 = scmp.lt.u32.totalorder %s60_s13, %s154_s0 }
   0x5   :  { %p66_p2 = pnand %p64_p1, %p61_p0 }
   0x7   :  { %69 = shalt.err (!%p66_p2)
}
   0x8   :  { %s70_s18 = scalar_lea.vmem %s16_s10, 128  ;;  %p75_p4 = scmp.lt.s32.totalorder %s16_s10, %s16_s10 }
   0x9   :  { %p71_p3 = scmp.ne.s32.totalorder %s16_s10, %s70_s18  ;;  %p76_p5 = scmp.lt.s32.totalorder %s70_s18, %s70_s18 }
   0xb   :  { %p77_p6 = por %p76_p5, %p75_p4 }
   0xd   :  { %p78_p7 = pnand %p77_p6, %p71_p3 }
   0xf   :  { %81 = shalt.err (!%p78_p7)
}
  0x10   :  { %18 = dma.hbm_to_vmem [thread:$0]  %s154_s0, 128, %s16_s10, [#allocation3]  }
  0x11   :  { %104 = dma.done.wait [#allocation3], 128  }
  0x12   :  { %105 = vsyncadd [#allocation3], 4294967168  ;;  %v109_v0 = vmov 0   ;;  %v25_v1 = vld [vmem:[%s155_s1] sm:$0xf]  ;;  %v33_v4 = vlaneseq  ;;  %s111_s23 = smov [#allocation5]  }
  0x13   :  { %59 = vset.pattern.permute.xlu0 %v109_v0  ;;  %v110_v2 = vmov 839922192   ;;  %v24_v9 = vld [vmem:[#allocation2] sm:$0xff]  ;;  %s46_s24 = sshll.u32 %s111_s23, 4  ;;  %s47_s24 = int_to_ptr.vmem [resolvable:$true] %s46_s24 }
  0x14   :  { %28 = vperm.xlu0 %59, %v25_v1   ;;  %v31_v3 = vunpack.c.l.s4 %v110_v2  ;;  %v34_v6 = vshrl.u32 %v33_v4, 7  ;;  %s82_s0 = scalar_lea.vmem %s47_s24, 128  ;;  %p87_p9 = scmp.lt.s32.totalorder %s47_s24, %s47_s24 }
  0x15   :  { %p83_p8 = scmp.ne.s32.totalorder %s47_s24, %s82_s0  ;;  %p88_p10 = scmp.lt.s32.totalorder %s82_s0, %s82_s0 }
  0x16   :  { %v32_v5 = vunpack.c.0.s8 %v31_v3 }
  0x17   :  { %p89_p11 = por %p88_p10, %p87_p9 }
  0x18   :  { %v35_v7 = vsub.s32 %v32_v5, %v34_v6 }
  0x19   :  { %p90_p12 = pnand %p89_p11, %p83_p8 }
  0x93   :  { %v29_v8 = vpop.permute.xlu0 %28 }
  0x94   :  { %v36_v10 = vrot.slane %v29_v8, %v35_v7 }
  0x96   :  { %v38_v11 = vmul.f32 %v36_v10, %v24_v9 }
  0x98   :  { %39 = vst [vmem:[#allocation5] sm:$0xff] %v38_v11 }
  0x99   :  { %93 = shalt.err (!%p90_p12)
}
  0x9a   :  { %s94_s26 = scalar_lea.hbm %s156_s2, 128 }
  0x9b   :  { %p95_p13 = scmp.ne.s32.totalorder %s156_s2, %s94_s26  ;;  %p98_p0 = scmp.lt.u32.totalorder %s94_s26, %s156_s2 }
  0x9d   :  { %p100_p1 = pnand %p98_p0, %p95_p13 }
  0x9f   :  { %103 = shalt.err (!%p100_p1)
}
  0xa0   :  { %49 = dma.vmem_to_hbm [thread:$0]  %s47_s24, 128, %s156_s2, [#allocation4]  }
  0xa1   :  { %106 = dma.done.wait [#allocation4], 128  }
  0xa2   :  { %107 = vsyncadd [#allocation4], 4294967168 }
  0xa3   :  { %53 = vsyncpa [#allocation3], 1 }
  0xa4   :  { %54 = vsyncpa [#allocation4], 1 }

</bundles_post_ra>
